<compile_context>
chip_gen: v7x
topology: tpu7x:2x2x1
jax: 0.10.0
libtpu: 0.0.40
codegen_flags: <defaults>
</compile_context>

<pallas_src>
import math

import jax
import jax.numpy as jnp
from jax.experimental import pallas as pl
from jax.experimental.pallas import tpu as pltpu

UNITS1 = 400
UNITS2 = 300

S_PAD_MULT = 128      # state dim padded to a multiple of 128
H1_PAD = 512          # 400 -> 512 (minimal 128-multiple)
H2_PAD = 384          # 300 -> 384 (minimal 128-multiple; was 512)
A_PAD_MULT = 128      # action dim padded to a multiple of 128

GRIDLESS_MAX_ROWS = 512   # single-block (no grid) path for small batches
TB_LARGE = 512            # batch tile for the gridded large-batch path


def _round_up(x, m):
    return (x + m - 1) // m * m


# ---------------------------------------------------------------------------
# Kernel
# ---------------------------------------------------------------------------
def actor_kernel(s_ref, w1_ref, b1_ref, w2_ref, s2_ref, b2_ref, w3_ref, b3_ref,
                 o_ref):
    # fc_1 + ReLU : bf16 operands, f32 accumulation
    x = s_ref[...]                                                # (TB, S_PAD) bf16
    h1 = jnp.dot(x, w1_ref[...], preferred_element_type=jnp.float32) + b1_ref[...]
    h1 = jnp.maximum(h1, 0.0).astype(jnp.bfloat16)                # (TB, H1_PAD)

    # fc_2 + ReLU : int8-stored weight, dequant (per-out-channel scale) after
    # the f32 accumulate.  int8 values are exactly representable in bf16.
    w2 = w2_ref[...].astype(jnp.bfloat16)                         # (H1_PAD, H2_PAD)
    h2 = jnp.dot(h1, w2, preferred_element_type=jnp.float32) * s2_ref[...] + b2_ref[...]
    h2 = jnp.maximum(h2, 0.0).astype(jnp.bfloat16)                # (TB, H2_PAD)

    # fc_3 + tanh : lane-dense padded output (cropped in the wrapper)
    out = jnp.dot(h2, w3_ref[...], preferred_element_type=jnp.float32) + b3_ref[...]
    o_ref[...] = jnp.tanh(out).astype(o_ref.dtype)                # (TB, A_PAD)


# ---------------------------------------------------------------------------
# Parameter init (mirrors the PyTorch module, incl. its hidden_init quirk)
# ---------------------------------------------------------------------------
def init_actor_params(key, state_size, action_size,
                      fc1_units=UNITS1, fc2_units=UNITS2):
    """Logical (unpadded, f32) params.  Weights stored (in, out).

    hidden_init() in the reference uses weight.size()[0] (= out_features) as
    "fan_in" -- that quirk is reproduced.  Biases keep the default nn.Linear
    range (+-1/sqrt(in_features)).
    """
    ks = jax.random.split(key, 6)

    def u(k, shape, lim):
        return jax.random.uniform(k, shape, jnp.float32, minval=-lim, maxval=lim)

    lim1 = 1.0 / math.sqrt(fc1_units)      # quirk: out_features
    lim2 = 1.0 / math.sqrt(fc2_units)      # quirk: out_features
    lim3 = 0.003
    w1 = u(ks[0], (state_size, fc1_units), lim1)
    b1 = u(ks[1], (1, fc1_units), 1.0 / math.sqrt(state_size))
    w2 = u(ks[2], (fc1_units, fc2_units), lim2)
    b2 = u(ks[3], (1, fc2_units), 1.0 / math.sqrt(fc1_units))
    w3 = u(ks[4], (fc2_units, action_size), lim3)
    b3 = u(ks[5], (1, action_size), 1.0 / math.sqrt(fc2_units))
    return dict(w1=w1, b1=b1, w2=w2, b2=b2, w3=w3, b3=b3)


def _quantize_per_out_channel_int8(w):
    """Symmetric per-output-channel int8 quantization of a (in, out) weight."""
    amax = jnp.max(jnp.abs(w), axis=0, keepdims=True)             # (1, out)
    scale = jnp.where(amax > 0, amax / 127.0, 1.0)
    q = jnp.clip(jnp.round(w / scale), -127, 127).astype(jnp.int8)
    return q, scale.astype(jnp.float32)


def prepare_padded_params(params, state_size, action_size):
    """Zero-pad to lane-aligned shapes; w1/w3 -> bf16, w2 -> int8 + f32 scales,
    biases -> f32."""
    s_pad = _round_up(state_size, S_PAD_MULT)
    a_pad = _round_up(action_size, A_PAD_MULT)

    def pad2(x, shape, dtype):
        out = jnp.zeros(shape, dtype)
        return out.at[: x.shape[0], : x.shape[1]].set(x.astype(dtype))

    w2q, w2s = _quantize_per_out_channel_int8(params["w2"])
    s2 = jnp.ones((1, H2_PAD), jnp.float32).at[:, : w2s.shape[1]].set(w2s)

    return dict(
        w1=pad2(params["w1"], (s_pad, H1_PAD), jnp.bfloat16),
        b1=pad2(params["b1"], (1, H1_PAD), jnp.float32),
        w2q=pad2(w2q, (H1_PAD, H2_PAD), jnp.int8),
        s2=s2,
        b2=pad2(params["b2"], (1, H2_PAD), jnp.float32),
        w3=pad2(params["w3"], (H2_PAD, a_pad), jnp.bfloat16),
        b3=pad2(params["b3"], (1, a_pad), jnp.float32),
    ), s_pad, a_pad


# ---------------------------------------------------------------------------
# Forward wrapper
# ---------------------------------------------------------------------------
def actor_forward(state, padded_params, state_size, action_size,
                  out_dtype=jnp.float32):
    """state: (B, state_size) f32 -> (B, action_size) `out_dtype`."""
    B = state.shape[0]
    s_pad = _round_up(state_size, S_PAD_MULT)
    a_pad = _round_up(action_size, A_PAD_MULT)
    p = padded_params

    # bf16 packs (16,128) per vreg -> keep batch tiles multiples of 16.
    small = _round_up(B, 16) <= GRIDLESS_MAX_ROWS
    b_pad = _round_up(B, 16) if small else _round_up(B, TB_LARGE)

    # Single fused pad: batch rows -> b_pad, feature dim -> s_pad, cast bf16.
    x = jnp.pad(state.astype(jnp.bfloat16),
                ((0, b_pad - B), (0, s_pad - state_size)))

    param_bytes = sum(int(v.size) * v.dtype.itemsize for v in p.values())
    cost = pl.CostEstimate(
        flops=2 * b_pad * (s_pad * H1_PAD + H1_PAD * H2_PAD + H2_PAD * a_pad),
        transcendentals=b_pad * a_pad,
        bytes_accessed=(x.size * 2 + param_bytes
                        + b_pad * a_pad * jnp.dtype(out_dtype).itemsize),
    )

    args = (x, p["w1"], p["b1"], p["w2q"], p["s2"], p["b2"], p["w3"], p["b3"])
    out_shape = jax.ShapeDtypeStruct((b_pad, a_pad), out_dtype)

    if small:
        # Whole problem fits one block: grid-less call, everything in VMEM,
        # no pipelining prologue/epilogue (B~4 is launch/DMA-overhead bound).
        out_padded = pl.pallas_call(
            actor_kernel, out_shape=out_shape, cost_estimate=cost,
        )(*args)
    else:
        TB = TB_LARGE
        grid = (b_pad // TB,)
        resident = lambda i: (0, 0)   # weights/biases: same block every step
        out_padded = pl.pallas_call(
            actor_kernel,
            out_shape=out_shape,
            grid=grid,
            in_specs=[
                pl.BlockSpec((TB, s_pad), lambda i: (i, 0)),     # state tile
                pl.BlockSpec((s_pad, H1_PAD), resident),         # w1 (bf16)
                pl.BlockSpec((1, H1_PAD), resident),             # b1
                pl.BlockSpec((H1_PAD, H2_PAD), resident),        # w2 (int8)
                pl.BlockSpec((1, H2_PAD), resident),             # w2 scales
                pl.BlockSpec((1, H2_PAD), resident),             # b2
                pl.BlockSpec((H2_PAD, a_pad), resident),         # w3 (bf16)
                pl.BlockSpec((1, a_pad), resident),              # b3
            ],
            out_specs=pl.BlockSpec((TB, a_pad), lambda i: (i, 0)),
            compiler_params=pltpu.CompilerParams(
                dimension_semantics=("parallel",)),              # v7x: 2 TCs
            cost_estimate=cost,
        )(*args)

    # Crop padding (rows beyond B and action columns beyond action_size).
    return out_padded[:B, :action_size]


# ---------------------------------------------------------------------------
# Pure-JAX references
# ---------------------------------------------------------------------------
def actor_ref_f32(state, p):
    h1 = jnp.maximum(state @ p["w1"] + p["b1"], 0.0)
    h2 = jnp.maximum(h1 @ p["w2"] + p["b2"], 0.0)
    return jnp.tanh(h2 @ p["w3"] + p["b3"])


def actor_ref_quant(state, pp, state_size, action_size, s_pad):
    """Same padded bf16 / int8-w2 math as the kernel, in plain JAX."""
    x = jnp.pad(state.astype(jnp.bfloat16), ((0, 0), (0, s_pad - state_size)))
    h1 = jnp.maximum(
        jnp.dot(x, pp["w1"], preferred_element_type=jnp.float32) + pp["b1"], 0.0
    ).astype(jnp.bfloat16)
    w2 = pp["w2q"].astype(jnp.bfloat16)
    h2 = jnp.maximum(
        jnp.dot(h1, w2, preferred_element_type=jnp.float32) * pp["s2"] + pp["b2"],
        0.0).astype(jnp.bfloat16)
    out = jnp.tanh(jnp.dot(h2, pp["w3"], preferred_element_type=jnp.float32)
                   + pp["b3"])
    return out[:, :action_size]


if __name__ == "__main__":
    key = jax.random.PRNGKey(0)
    k_params, k_state, k_big = jax.random.split(key, 3)

    state_size = 16
    action_size = 4

    params = init_actor_params(k_params, state_size, action_size)
    padded_params, s_pad, a_pad = prepare_padded_params(params, state_size,
                                                        action_size)

    # --- small (production-like) batch: grid-less path, f32 output ----------
    batch = 4
    state = jax.random.normal(k_state, (batch, state_size), jnp.float32)
    out = actor_forward(state, padded_params, state_size, action_size)
    out = jax.block_until_ready(out)
    assert out.shape == (batch, action_size)

    ref_q = actor_ref_quant(state, padded_params, state_size, action_size, s_pad)
    assert jnp.allclose(out, ref_q, atol=1e-3, rtol=1e-3), \
        "mismatch vs quantized JAX reference (small batch)"
    ref_f = actor_ref_f32(state, params)
    assert jnp.allclose(out, ref_f, atol=2e-2, rtol=2e-2), \
        "mismatch vs f32 JAX reference (small batch)"

    # --- large batch: gridded path (2 steps), bf16 output -------------------
    big = 1000
    state_big = jax.random.normal(k_big, (big, state_size), jnp.float32)
    out_big = actor_forward(state_big, padded_params, state_size, action_size,
                            out_dtype=jnp.bfloat16)
    out_big = jax.block_until_ready(out_big)
    assert out_big.shape == (big, action_size)
    ref_big = actor_ref_f32(state_big, params)
    assert jnp.allclose(out_big.astype(jnp.float32), ref_big,
                        atol=2e-2, rtol=2e-2), \
        "mismatch vs f32 JAX reference (large batch)"

    print("KERNEL_OK")
</pallas_src>

<mosaic_0001>
module attributes {stable_mosaic.version = 11 : i64} {
  func.func @actor_kernel(%arg0: memref<16x128xbf16, #tpu.memory_space<vmem>>, %arg1: memref<128x512xbf16, #tpu.memory_space<vmem>>, %arg2: memref<1x512xf32, #tpu.memory_space<vmem>>, %arg3: memref<512x384xi8, #tpu.memory_space<vmem>>, %arg4: memref<1x384xf32, #tpu.memory_space<vmem>>, %arg5: memref<1x384xf32, #tpu.memory_space<vmem>>, %arg6: memref<384x128xbf16, #tpu.memory_space<vmem>>, %arg7: memref<1x128xf32, #tpu.memory_space<vmem>>, %arg8: memref<16x128xf32, #tpu.memory_space<vmem>>) attributes {dimension_semantics = [], scalar_prefetch = 0 : i64, scratch_operands = 0 : i64, tpu.core_type = #tpu.core_type<tc>} {
    %c0 = arith.constant 0 : index
    %c0_0 = arith.constant 0 : index
    %0 = vector.load %arg0[%c0, %c0_0] : memref<16x128xbf16, #tpu.memory_space<vmem>>, vector<16x128xbf16>
    %c0_1 = arith.constant 0 : index
    %c0_2 = arith.constant 0 : index
    %1 = vector.load %arg1[%c0_1, %c0_2] : memref<128x512xbf16, #tpu.memory_space<vmem>>, vector<128x512xbf16>
    %cst = arith.constant dense<0.000000e+00> : vector<16x512xf32>
    %2 = tpu.matmul %0, %1, %cst {dimension_numbers = #tpu.dot_dimension_numbers<[1], [0], [0], [1], [0, 0, 1, 1], [], []>} : vector<16x128xbf16>, vector<128x512xbf16>, vector<16x512xf32> -> vector<16x512xf32>
    %c0_3 = arith.constant 0 : index
    %c0_4 = arith.constant 0 : index
    %3 = vector.load %arg2[%c0_3, %c0_4] : memref<1x512xf32, #tpu.memory_space<vmem>>, vector<1x512xf32>
    %4 = vector.broadcast %3 : vector<1x512xf32> to vector<16x512xf32>
    %5 = arith.addf %2, %4 : vector<16x512xf32>
    %cst_5 = arith.constant 0.000000e+00 : f32
    %6 = vector.broadcast %cst_5 : f32 to vector<16x512xf32>
    %7 = arith.maximumf %5, %6 : vector<16x512xf32>
    %8 = arith.truncf %7 : vector<16x512xf32> to vector<16x512xbf16>
    %c0_6 = arith.constant 0 : index
    %c0_7 = arith.constant 0 : index
    %9 = vector.load %arg3[%c0_6, %c0_7] : memref<512x384xi8, #tpu.memory_space<vmem>>, vector<512x384xi8>
    %10 = arith.sitofp %9 : vector<512x384xi8> to vector<512x384xbf16>
    %cst_8 = arith.constant dense<0.000000e+00> : vector<16x384xf32>
    %11 = tpu.matmul %8, %10, %cst_8 {dimension_numbers = #tpu.dot_dimension_numbers<[1], [0], [0], [1], [0, 0, 1, 1], [], []>} : vector<16x512xbf16>, vector<512x384xbf16>, vector<16x384xf32> -> vector<16x384xf32>
    %c0_9 = arith.constant 0 : index
    %c0_10 = arith.constant 0 : index
    %12 = vector.load %arg4[%c0_9, %c0_10] : memref<1x384xf32, #tpu.memory_space<vmem>>, vector<1x384xf32>
    %13 = vector.broadcast %12 : vector<1x384xf32> to vector<16x384xf32>
    %14 = arith.mulf %11, %13 : vector<16x384xf32>
    %c0_11 = arith.constant 0 : index
    %c0_12 = arith.constant 0 : index
    %15 = vector.load %arg5[%c0_11, %c0_12] : memref<1x384xf32, #tpu.memory_space<vmem>>, vector<1x384xf32>
    %16 = vector.broadcast %15 : vector<1x384xf32> to vector<16x384xf32>
    %17 = arith.addf %14, %16 : vector<16x384xf32>
    %cst_13 = arith.constant 0.000000e+00 : f32
    %18 = vector.broadcast %cst_13 : f32 to vector<16x384xf32>
    %19 = arith.maximumf %17, %18 : vector<16x384xf32>
    %20 = arith.truncf %19 : vector<16x384xf32> to vector<16x384xbf16>
    %c0_14 = arith.constant 0 : index
    %c0_15 = arith.constant 0 : index
    %21 = vector.load %arg6[%c0_14, %c0_15] : memref<384x128xbf16, #tpu.memory_space<vmem>>, vector<384x128xbf16>
    %cst_16 = arith.constant dense<0.000000e+00> : vector<16x128xf32>
    %22 = tpu.matmul %20, %21, %cst_16 {dimension_numbers = #tpu.dot_dimension_numbers<[1], [0], [0], [1], [0, 0, 1, 1], [], []>} : vector<16x384xbf16>, vector<384x128xbf16>, vector<16x128xf32> -> vector<16x128xf32>
    %c0_17 = arith.constant 0 : index
    %c0_18 = arith.constant 0 : index
    %23 = vector.load %arg7[%c0_17, %c0_18] : memref<1x128xf32, #tpu.memory_space<vmem>>, vector<1x128xf32>
    %24 = vector.broadcast %23 : vector<1x128xf32> to vector<16x128xf32>
    %25 = arith.addf %22, %24 : vector<16x128xf32>
    %26 = math.tanh %25 : vector<16x128xf32>
    %c0_19 = arith.constant 0 : index
    %c0_20 = arith.constant 0 : index
    %27 = vector.load %arg8[%c0_19, %c0_20] : memref<16x128xf32, #tpu.memory_space<vmem>>, vector<16x128xf32>
    tpu.vector_store %arg8[%c0_19, %c0_20], %26 {strides = array<i32>} : memref<16x128xf32, #tpu.memory_space<vmem>>, vector<16x128xf32>,
    return
  }
}

</mosaic_0001>

<bundles_post_ra>
// kernel: tpu_custom_call.1
= control target key start
LH: loop header
LB: loop body
LE: loop exit
PB: predicated region body
PF: predicated region fallthrough
CT: control target
= control target key end

     0   :  { %13 = vsyncpa [#allocation3], 0  ;;  %s1612_s0 = inlined_call_operand.hbm [shape: bf16[16,128], index: 0, kind: input, shape index: {}]   ;;  %s1613_s1 = inlined_call_operand.hbm [shape: bf16[128,512], index: 1, kind: input, shape index: {}]   ;;  %s1614_s2 = inlined_call_operand.vmem [shape: f32[1,512], index: 2, kind: input, shape index: {}]   ;;  %s1615_s3 = inlined_call_operand.hbm [shape: s8[512,384], index: 3, kind: input, shape index: {}]   ;;  %s1616_s4 = inlined_call_operand.vmem [shape: f32[1,384], index: 4, kind: input, shape index: {}]   ;;  %s1617_s5 = inlined_call_operand.vmem [shape: f32[1,384], index: 5, kind: input, shape index: {}]   ;;  %s1618_s6 = inlined_call_operand.hbm [shape: bf16[384,128], index: 6, kind: input, shape index: {}]   ;;  %s1619_s7 = inlined_call_operand.vmem [shape: f32[1,128], index: 7, kind: input, shape index: {}]   ;;  %s1620_s8 = inlined_call_operand.hbm [shape: f32[16,128], index: 8, kind: output, shape index: {}]  }
   0x1   :  { %14 = vsyncpa [#allocation6], 0 }
   0x2   :  { %15 = vsyncpa [#allocation9], 0 }
   0x3   :  { %16 = vsyncpa [#allocation4], 0  ;;  %s1445_s27 = smov [#allocation5]   ;;  %s1327_s9 = scalar_lea.hbm %s1613_s1, 4096 }
   0x4   :  { %s34_s28 = sshll.u32 %s1445_s27, 4  ;;  %p1328_p0 = scmp.ne.s32.totalorder %s1613_s1, %s1327_s9  ;;  %s35_s28 = int_to_ptr.vmem [resolvable:$true] %s34_s28 }
   0x5   :  { %p1331_p1 = scmp.lt.u32.totalorder %s1327_s9, %s1613_s1 }
   0x7   :  { %p1333_p2 = pnand %p1331_p1, %p1328_p0 }
   0x9   :  { %1336 = shalt.err (!%p1333_p2)
}
   0xa   :  { %s1337_s14 = scalar_lea.vmem %s35_s28, 4096  ;;  %p1342_p4 = scmp.lt.s32.totalorder %s35_s28, %s35_s28 }
   0xb   :  { %p1338_p3 = scmp.ne.s32.totalorder %s35_s28, %s1337_s14  ;;  %p1343_p5 = scmp.lt.s32.totalorder %s1337_s14, %s1337_s14 }
   0xd   :  { %p1344_p6 = por %p1343_p5, %p1342_p4 }
   0xf   :  { %p1345_p7 = pnand %p1344_p6, %p1338_p3 }
  0x11   :  { %1348 = shalt.err (!%p1345_p7)
}
  0x12   :  { %s1446_s15 = smov 256   ;;  %s1447_s16 = smov 16  }
  0x13   :  { %40 = dma.hbm_to_vmem [thread:$0]  %s1613_s1, 4096, %s35_s28, [#allocation6], %s1446_s15, %s1446_s15, %s1447_s16  }
  0x14   :  { %s1448_s19 = smov [#allocation2]   ;;  %s1349_s23 = scalar_lea.hbm %s1612_s0, 128 }
  0x15   :  { %s22_s20 = sshll.u32 %s1448_s19, 4  ;;  %p1350_p8 = scmp.ne.s32.totalorder %s1612_s0, %s1349_s23  ;;  %s23_s20 = int_to_ptr.vmem [resolvable:$true] %s22_s20 }
  0x16   :  { %p1353_p9 = scmp.lt.u32.totalorder %s1349_s23, %s1612_s0 }
  0x18   :  { %p1355_p10 = pnand %p1353_p9, %p1350_p8 }
  0x1a   :  { %1358 = shalt.err (!%p1355_p10)
}
  0x1b   :  { %s1359_s29 = scalar_lea.vmem %s23_s20, 128  ;;  %p1364_p12 = scmp.lt.s32.totalorder %s23_s20, %s23_s20 }
  0x1c   :  { %p1360_p11 = scmp.ne.s32.totalorder %s23_s20, %s1359_s29  ;;  %p1365_p13 = scmp.lt.s32.totalorder %s1359_s29, %s1359_s29 }
  0x1e   :  { %p1366_p0 = por %p1365_p13, %p1364_p12 }
  0x20   :  { %p1367_p1 = pnand %p1366_p0, %p1360_p11 }
  0x22   :  { %1370 = shalt.err (!%p1367_p1)
}
  0x23   :  { %s1449_s1 = smov 64   ;;  %s1450_s28 = smov 4  }
  0x24   :  { %28 = dma.hbm_to_vmem [thread:$0]  %s1612_s0, 128, %s23_s20, [#allocation3], %s1449_s1, %s1449_s1, %s1450_s28  }
  0x25   :  { %s1451_s10 = smov [#allocation7]   ;;  %s1371_s14 = scalar_lea.hbm %s1615_s3, 6144 }
  0x26   :  { %s48_s11 = sshll.u32 %s1451_s10, 4  ;;  %p1372_p2 = scmp.ne.s32.totalorder %s1615_s3, %s1371_s14  ;;  %s49_s11 = int_to_ptr.vmem [resolvable:$true] %s48_s11 }
  0x27   :  { %p1375_p3 = scmp.lt.u32.totalorder %s1371_s14, %s1615_s3 }
  0x29   :  { %p1377_p4 = pnand %p1375_p3, %p1372_p2 }
  0x2b   :  { %1380 = shalt.err (!%p1377_p4)
}
  0x2c   :  { %s1381_s19 = scalar_lea.vmem %s49_s11, 6144  ;;  %p1386_p6 = scmp.lt.s32.totalorder %s49_s11, %s49_s11 }
  0x2d   :  { %p1382_p5 = scmp.ne.s32.totalorder %s49_s11, %s1381_s19  ;;  %p1387_p7 = scmp.lt.s32.totalorder %s1381_s19, %s1381_s19 }
  0x2f   :  { %p1388_p8 = por %p1387_p7, %p1386_p6 }
  0x31   :  { %p1389_p9 = pnand %p1388_p8, %p1382_p5 }
  0x33   :  { %1392 = shalt.err (!%p1389_p9)
}
  0x34   :  { %s1452_s0 = smov 384   ;;  %s1453_s20 = smov 24  }
  0x35   :  { %54 = dma.hbm_to_vmem [thread:$0]  %s1615_s3, 6144, %s49_s11, [#allocation6], %s1452_s0, %s1452_s0, %s1453_s20  }
  0x36   :  { %s1454_s23 = smov [#allocation8]   ;;  %s1393_s27 = scalar_lea.hbm %s1618_s6, 3072 }
  0x37   :  { %s64_s24 = sshll.u32 %s1454_s23, 4  ;;  %p1394_p10 = scmp.ne.s32.totalorder %s1618_s6, %s1393_s27  ;;  %s65_s24 = int_to_ptr.vmem [resolvable:$true] %s64_s24 }
  0x38   :  { %p1397_p11 = scmp.lt.u32.totalorder %s1393_s27, %s1618_s6 }
  0x3a   :  { %p1399_p12 = pnand %p1397_p11, %p1394_p10 }
  0x3c   :  { %1402 = shalt.err (!%p1399_p12)
}
  0x3d   :  { %s1403_s12 = scalar_lea.vmem %s65_s24, 3072  ;;  %p1408_p0 = scmp.lt.s32.totalorder %s65_s24, %s65_s24 }
  0x3e   :  { %p1404_p13 = scmp.ne.s32.totalorder %s65_s24, %s1403_s12  ;;  %p1409_p1 = scmp.lt.s32.totalorder %s1403_s12, %s1403_s12 }
  0x40   :  { %p1410_p2 = por %p1409_p1, %p1408_p0 }
  0x42   :  { %p1411_p3 = pnand %p1410_p2, %p1404_p13 }
  0x44   :  { %1414 = shalt.err (!%p1411_p3)
}
  0x45   :  { %70 = dma.hbm_to_vmem [thread:$0]  %s1618_s6, 3072, %s65_s24, [#allocation9], %s1449_s1, %s1449_s1, %s1450_s28  }
  0x46   :  { %1437 = dma.done.wait [#allocation3], 128  }
  0x47   :  { %1438 = vsyncadd [#allocation3], 4294967168 }
  0x48   :  { %1439 = dma.done.wait [#allocation6], 10240  }
  0x49   :  { %1440 = vsyncadd [#allocation6], 4294957056 }
  0x4a   :  { %1441 = dma.done.wait [#allocation9], 3072  }
  0x4b   :  { %1442 = vsyncadd [#allocation9], 4294964224  ;;  %v1455_v0 = vmov 0   ;;  %v1250_v1 = vld [vmem:[#allocation5 + $0x4] ss:$16 sps:$4 sm:$0xff]   ;;  %v407_v25 = vld [vmem:[#allocation7 + $0x8] sm:$0xff] }
  0x4c   :  { %340 = vmatprep.mubr.bf16.mxu0 %v1455_v0  ;;  %383 = vmatprep.mubr.bf16.mxu1 %v1455_v0  ;;  %v1252_v2 = vld [vmem:[#allocation5] ss:$16 sps:$4 sm:$0xff]   ;;  %v1253_v3 = vld [vmem:[#allocation5 + $0x24] ss:$16 sps:$4 sm:$0xff]   ;;  %v1274_v9 = vld [vmem:[#allocation5 + $0xc] ss:$16 sps:$4 sm:$0xff]   ;;  %v455_v31 = vunpack.c.l.s8.bf16 %v407_v25  ;;  %v458_v37 = vunpack.c.h.s8.bf16 %v407_v25 }
  0x4d   :  { %308 = vmatprep.subr.bf16.mxu0 %v1250_v1  ;;  %v1255_v4 = vld [vmem:[#allocation5 + $0x20] ss:$16 sps:$4 sm:$0xff]   ;;  %v1256_v5 = vld [vmem:[#allocation5 + $0x44] ss:$16 sps:$4 sm:$0xff]   ;;  %v1277_v11 = vld [vmem:[#allocation5 + $0x8] ss:$16 sps:$4 sm:$0xff]   ;;  %351 = vmatprep.subr.bf16.mxu1 %v1274_v9 }
  0x4e   :  { %309 = vmatpush1.bf16.msra.mxu0 %v1252_v2  ;;  %v1258_v6 = vld [vmem:[#allocation5 + $0x40] ss:$16 sps:$4 sm:$0xff]   ;;  %v1259_v7 = vld [vmem:[#allocation5 + $0x64] ss:$16 sps:$4 sm:$0xff]   ;;  %v1278_v12 = vld [vmem:[#allocation5 + $0x2c] ss:$16 sps:$4 sm:$0xff]   ;;  %352 = vmatpush1.bf16.msra.mxu1 %v1277_v11 }
  0x4f   :  { %310 = vmatprep.subr.bf16.mxu0 %v1253_v3  ;;  %v1261_v8 = vld [vmem:[#allocation5 + $0x60] ss:$16 sps:$4 sm:$0xff]   ;;  %v1262_v10 = vld [vmem:[#allocation5 + $0x84] ss:$16 sps:$4 sm:$0xff]   ;;  %v1280_v13 = vld [vmem:[#allocation5 + $0x28] ss:$16 sps:$4 sm:$0xff]   ;;  %353 = vmatprep.subr.bf16.mxu1 %v1278_v12 }
  0x50   :  { %v1264_v14 = vld [vmem:[#allocation5 + $0x80] ss:$16 sps:$4 sm:$0xff]   ;;  %v1281_v15 = vld [vmem:[#allocation5 + $0x4c] ss:$16 sps:$4 sm:$0xff]   ;;  %v1265_v16 = vld [vmem:[#allocation5 + $0xa4] ss:$16 sps:$4 sm:$0xff]  }
  0x51   :  { %v1283_v17 = vld [vmem:[#allocation5 + $0x48] ss:$16 sps:$4 sm:$0xff]   ;;  %v1267_v18 = vld [vmem:[#allocation5 + $0xa0] ss:$16 sps:$4 sm:$0xff]   ;;  %v1284_v19 = vld [vmem:[#allocation5 + $0x6c] ss:$16 sps:$4 sm:$0xff]  }
  0x52   :  { %311 = vmatpush1.bf16.msra.mxu0 %v1255_v4  ;;  %354 = vmatpush1.bf16.msra.mxu1 %v1280_v13  ;;  %v1268_v20 = vld [vmem:[#allocation5 + $0xc4] ss:$16 sps:$4 sm:$0xff]   ;;  %v1286_v21 = vld [vmem:[#allocation5 + $0x68] ss:$16 sps:$4 sm:$0xff]   ;;  %v1270_v22 = vld [vmem:[#allocation5 + $0xc0] ss:$16 sps:$4 sm:$0xff]  }
  0x53   :  { %312 = vmatprep.subr.bf16.mxu0 %v1256_v5  ;;  %355 = vmatprep.subr.bf16.mxu1 %v1281_v15  ;;  %v1287_v23 = vld [vmem:[#allocation5 + $0x8c] ss:$16 sps:$4 sm:$0xff]   ;;  %v1271_v24 = vld [vmem:[#allocation5 + $0xe4] ss:$16 sps:$4 sm:$0xff]   ;;  %v1289_v26 = vld [vmem:[#allocation5 + $0x88] ss:$16 sps:$4 sm:$0xff]  }
  0x54   :  { %v1273_v27 = vld [vmem:[#allocation5 + $0xe0] ss:$16 sps:$4 sm:$0xff]   ;;  %v1290_v28 = vld [vmem:[#allocation5 + $0xac] ss:$16 sps:$4 sm:$0xff]   ;;  %v1292_v30 = vld [vmem:[#allocation5 + $0xa8] ss:$16 sps:$4 sm:$0xff]  }
  0x55   :  { %v1276_v29 = vld [vmem:[#allocation2] sm:$0xff]   ;;  %v406_v32 = vld [vmem:[#allocation7] sm:$0xff]  ;;  %v420_v40 = vld [vmem:[#allocation7 + $0x70] sm:$0xff]  ;;  %vm1457_vm0 = vmmov 0   ;;  %s1458_s15 = smov [#allocation10]  }
  0x56   :  { %313 = vmatpush1.bf16.msra.mxu0 %v1258_v6  ;;  %356 = vmatpush1.bf16.msra.mxu1 %v1283_v17  ;;  %v1293_v33 = vld [vmem:[#allocation5 + $0xcc] ss:$16 sps:$4 sm:$0xff]   ;;  %v454_v34 = vunpack.c.l.s8.bf16 %v406_v32  ;;  %v410_v35 = vld [vmem:[#allocation7 + $0x20] sm:$0xff]  ;;  %v1295_v36 = vld [vmem:[#allocation5 + $0xc8] ss:$16 sps:$4 sm:$0xff]   ;;  %v457_v41 = vunpack.c.h.s8.bf16 %v406_v32  ;;  %v480_v47 = vunpack.c.l.s8.bf16 %v420_v40  ;;  %v483_v53 = vunpack.c.h.s8.bf16 %v420_v40  ;;  %s1063_s16 = sshll.u32 %s1458_s15, 4  ;;  %s1064_s16 = int_to_ptr.vmem [resolvable:$true] %s1063_s16 }
  0x57   :  { %314 = vmatprep.subr.bf16.mxu0 %v1259_v7  ;;  %357 = vmatprep.subr.bf16.mxu1 %v1284_v19  ;;  %v1296_v38 = vld [vmem:[#allocation5 + $0xec] ss:$16 sps:$4 sm:$0xff]   ;;  %v1298_v42 = vld [vmem:[#allocation5 + $0xe8] ss:$16 sps:$4 sm:$0xff]   ;;  %v461_v43 = vunpack.c.l.s8.bf16 %v410_v35  ;;  %v408_v44 = vld [vmem:[#allocation7 + $0x10] sm:$0xff]  ;;  %v464_v48 = vunpack.c.h.s8.bf16 %v410_v35  ;;  %s1415_s17 = scalar_lea.vmem %s1064_s16, 256  ;;  %p1420_p5 = scmp.lt.s32.totalorder %s1064_s16, %s1064_s16 }
  0x58   :  { %v409_v39 = vld [vmem:[#allocation7 + $0x18] sm:$0xff]  ;;  %v412_v49 = vld [vmem:[#allocation7 + $0x30] sm:$0xff]  ;;  %v456_v50 = vunpack.c.l.s8.bf16 %v408_v44  ;;  %v423_v51 = vld [vmem:[#allocation7 + $0x88] sm:$0xff]  ;;  %v459_v55 = vunpack.c.h.s8.bf16 %v408_v44  ;;  %p1416_p4 = scmp.ne.s32.totalorder %s1064_s16, %s1415_s17  ;;  %p1421_p6 = scmp.lt.s32.totalorder %s1415_s17, %s1415_s17 }
  0x59   :  { %v460_v45 = vunpack.c.l.s8.bf16 %v409_v39  ;;  %v413_v46 = vld [vmem:[#allocation7 + $0x38] sm:$0xff]  ;;  %v463_v52 = vunpack.c.h.s8.bf16 %v409_v39  ;;  %v466_v56 = vunpack.c.l.s8.bf16 %v412_v49  ;;  %v486_v57 = vunpack.c.l.s8.bf16 %v423_v51  ;;  %v411_v58 = vld [vmem:[#allocation7 + $0x28] sm:$0xff]  ;;  %v416_v60 = vld [vmem:[#allocation7 + $0x50] sm:$0xff] }
  0x5a   :  { %315 = vmatpush1.bf16.msra.mxu0 %v1261_v8  ;;  %358 = vmatpush1.bf16.msra.mxu1 %v1286_v21  ;;  %v467_v54 = vunpack.c.l.s8.bf16 %v413_v46  ;;  %v470_v59 = vunpack.c.h.s8.bf16 %v413_v46  ;;  %v462_v61 = vunpack.c.l.s8.bf16 %v411_v58  ;;  %v469_v62 = vunpack.c.h.s8.bf16 %v412_v49  ;;  %v415_v1 = vld [vmem:[#allocation7 + $0x48] sm:$0xff]  ;;  %v426_v2 = vld [vmem:[#allocation7 + $0xa0] sm:$0xff]  ;;  %v417_v35 = vld [vmem:[#allocation7 + $0x58] sm:$0xff]  ;;  %p1422_p7 = por %p1421_p6, %p1420_p5 }
  0x5b   :  { %316 = vmatprep.subr.bf16.mxu0 %v1262_v10  ;;  %359 = vmatprep.subr.bf16.mxu1 %v1287_v23  ;;  %v489_v63 = vunpack.c.h.s8.bf16 %v423_v51  ;;  %v473_v0 = vunpack.c.l.s8.bf16 %v416_v60  ;;  %v465_v3 = vunpack.c.h.s8.bf16 %v411_v58  ;;  %v472_v4 = vunpack.c.l.s8.bf16 %v415_v1  ;;  %v414_v6 = vld [vmem:[#allocation7 + $0x40] sm:$0xff]  ;;  %v419_v8 = vld [vmem:[#allocation7 + $0x68] sm:$0xff]  ;;  %v425_v23 = vld [vmem:[#allocation7 + $0x98] sm:$0xff] }
  0x5c   :  { %v492_v5 = vunpack.c.l.s8.bf16 %v426_v2  ;;  %v476_v7 = vunpack.c.h.s8.bf16 %v416_v60  ;;  %v468_v9 = vunpack.c.l.s8.bf16 %v414_v6  ;;  %v475_v10 = vunpack.c.h.s8.bf16 %v415_v1  ;;  %v418_v13 = vld [vmem:[#allocation7 + $0x60] sm:$0xff]  ;;  %v120_v49 = vld [vmem:[%s1614_s2] sm:$0xf]  ;;  %v432_v1 = vld [vmem:[#allocation7 + $0xd0] sm:$0xff]  ;;  %p1423_p8 = pnand %p1422_p7, %p1416_p4 }
  0x5d   :  { %v495_v11 = vunpack.c.h.s8.bf16 %v426_v2  ;;  %v479_v12 = vunpack.c.l.s8.bf16 %v419_v8  ;;  %v478_v15 = vunpack.c.l.s8.bf16 %v418_v13  ;;  %v422_v17 = vld [vmem:[#allocation7 + $0x80] sm:$0xff]  ;;  %v491_v25 = vunpack.c.l.s8.bf16 %v425_v23 }
  0x5e   :  { %317 = vmatpush1.bf16.msra.mxu0 %v1264_v14  ;;  %360 = vmatpush1.bf16.msra.mxu1 %v1289_v26  ;;  %v471_v14 = vunpack.c.h.s8.bf16 %v414_v6  ;;  %v485_v19 = vunpack.c.l.s8.bf16 %v422_v17  ;;  %v424_v26 = vld [vmem:[#allocation7 + $0x90] sm:$0xff]  ;;  %v122_v46 = vlaneseq }
  0x5f   :  { %318 = vmatprep.subr.bf16.mxu0 %v1265_v16  ;;  %361 = vmatprep.subr.bf16.mxu1 %v1290_v28  ;;  %v482_v16 = vunpack.c.h.s8.bf16 %v419_v8  ;;  %v494_v28 = vunpack.c.h.s8.bf16 %v425_v23  ;;  %v504_v8 = vunpack.c.l.s8.bf16 %v432_v1  ;;  %v435_v23 = vld [vmem:[#allocation7 + $0xe8] sm:$0xff] }
  0x62   :  { %319 = vmatpush1.bf16.msra.mxu0 %v1267_v18  ;;  %362 = vmatpush1.bf16.msra.mxu1 %v1292_v30  ;;  %v481_v18 = vunpack.c.h.s8.bf16 %v418_v13  ;;  %v428_v30 = vld [vmem:[#allocation7 + $0xb0] sm:$0xff]  ;;  %v434_v13 = vld [vmem:[#allocation7 + $0xe0] sm:$0xff] }
  0x63   :  { %320 = vmatprep.subr.bf16.mxu0 %v1268_v20  ;;  %363 = vmatprep.subr.bf16.mxu1 %v1293_v33  ;;  %v421_v20 = vld [vmem:[#allocation7 + $0x78] sm:$0xff]  ;;  %v497_v32 = vunpack.c.l.s8.bf16 %v428_v30 }
  0x64   :  { %v484_v21 = vunpack.c.l.s8.bf16 %v421_v20 }
  0x66   :  { %321 = vmatpush1.bf16.msra.mxu0 %v1270_v22  ;;  %364 = vmatpush1.bf16.msra.mxu1 %v1295_v36  ;;  %v488_v22 = vunpack.c.h.s8.bf16 %v422_v17  ;;  %v507_v17 = vunpack.c.h.s8.bf16 %v432_v1 }
  0x67   :  { %322 = vmatprep.subr.bf16.mxu0 %v1271_v24  ;;  %365 = vmatprep.subr.bf16.mxu1 %v1296_v38  ;;  %v487_v24 = vunpack.c.h.s8.bf16 %v421_v20  ;;  %v500_v38 = vunpack.c.h.s8.bf16 %v428_v30  ;;  %v509_v20 = vunpack.c.l.s8.bf16 %v434_v13 }
  0x6a   :  { %323 = vmatpush1.bf16.msra.mxu0 %v1273_v27  ;;  %366 = vmatpush1.bf16.msra.mxu1 %v1298_v42  ;;  %v490_v27 = vunpack.c.l.s8.bf16 %v424_v26  ;;  %v431_v42 = vld [vmem:[#allocation7 + $0xc8] sm:$0xff] }
  0x6b   :  { %550 = vmatprep.subr.bf16.mxu0 %v455_v31  ;;  %1135 = vmatprep.subr.bf16.mxu1 %v480_v47  ;;  %v429_v31 = vld [vmem:[#allocation7 + $0xb8] sm:$0xff]  ;;  %v503_v44 = vunpack.c.l.s8.bf16 %v431_v42  ;;  %v123_v47 = vshrl.u32 %v122_v46, 7  ;;  %v438_v46 = vld [vmem:[#allocation7 + $0x100] sm:$0xff] }
  0x6c   :  { %v498_v33 = vunpack.c.l.s8.bf16 %v429_v31  ;;  %v501_v39 = vunpack.c.h.s8.bf16 %v429_v31 }
  0x6d   :  { %341 = vmatmul.mubr.bf16.vlgmr.msra.gmra.mrb[0].mxu0 %v1276_v29  ;;  %384 = vmatmul.mubr.bf16.vlgmr.msra.gmra.mrb[0].mxu1 %v1276_v29  ;;  %v493_v29 = vunpack.c.h.s8.bf16 %v424_v26  ;;  %v136_v2 = vsub.s32 3, %v123_v47 }
  0x6e   :  { %551 = vmatpush1.bf16.msra.mxu0 %v454_v34  ;;  %1136 = vmatpush3.bf16.msra.mxu1 %v456_v50  ;;  %v427_v34 = vld [vmem:[#allocation7 + $0xa8] sm:$0xff]  ;;  %v1565_v50 = vsub.s32 1, %v123_v47 }
  0x6f   :  { %552 = vmatprep.subr.bf16.mxu0 %v458_v37  ;;  %1137 = vmatprep.subr.bf16.mxu1 %v483_v53  ;;  %v496_v36 = vunpack.c.l.s8.bf16 %v427_v34  ;;  %v474_v37 = vunpack.c.l.s8.bf16 %v417_v35  ;;  %v499_v40 = vunpack.c.h.s8.bf16 %v427_v34  ;;  %v512_v34 = vunpack.c.h.s8.bf16 %v434_v13 }
  0x72   :  { %553 = vmatpush1.bf16.msra.mxu0 %v457_v41  ;;  %1138 = vmatpush3.bf16.msra.mxu1 %v459_v55  ;;  %v477_v41 = vunpack.c.h.s8.bf16 %v417_v35 }
  0x73   :  { %554 = vmatprep.subr.bf16.mxu0 %v461_v43  ;;  %1139 = vmatprep.subr.bf16.mxu1 %v486_v57  ;;  %v444_v43 = vld [vmem:[#allocation7 + $0x130] sm:$0xff] }
  0x76   :  { %555 = vmatpush1.bf16.msra.mxu0 %v460_v45  ;;  %1140 = vmatpush3.bf16.msra.mxu1 %v462_v61  ;;  %v528_v45 = vunpack.c.l.s8.bf16 %v444_v43  ;;  %v1569_v61 = vsub.s32 2, %v123_v47 }
  0x77   :  { %556 = vmatprep.subr.bf16.mxu0 %v464_v48  ;;  %1141 = vmatprep.subr.bf16.mxu1 %v489_v63  ;;  %v1560_v48 = vsub.s32 0, %v123_v47 }
  0x79   :  { %v125_v51 = vrot.slane %v120_v49, %v1560_v48 }
  0x7a   :  { %557 = vmatpush1.bf16.msra.mxu0 %v463_v52  ;;  %1142 = vmatpush3.bf16.msra.mxu1 %v465_v3  ;;  %v129_v52 = vrot.slane %v120_v49, %v1565_v50 }
  0x7b   :  { %558 = vmatprep.subr.bf16.mxu0 %v467_v54  ;;  %1143 = vmatprep.subr.bf16.mxu1 %v492_v5 }
  0x7e   :  { %559 = vmatpush1.bf16.msra.mxu0 %v466_v56  ;;  %1144 = vmatpush3.bf16.msra.mxu1 %v468_v9  ;;  %v133_v9 = vrot.slane %v120_v49, %v1569_v61 }
  0x7f   :  { %560 = vmatprep.subr.bf16.mxu0 %v470_v59  ;;  %1145 = vmatprep.subr.bf16.mxu1 %v495_v11  ;;  %v531_v11 = vunpack.c.h.s8.bf16 %v444_v43 }
  0x82   :  { %561 = vmatpush1.bf16.msra.mxu0 %v469_v62  ;;  %1146 = vmatpush3.bf16.msra.mxu1 %v471_v14  ;;  %v447_v14 = vld [vmem:[#allocation7 + $0x148] sm:$0xff] }
  0x83   :  { %562 = vmatprep.subr.bf16.mxu0 %v473_v0  ;;  %1147 = vmatprep.subr.bf16.mxu1 %v498_v33  ;;  %v430_v0 = vld [vmem:[#allocation7 + $0xc0] sm:$0xff]  ;;  %v537_v35 = vunpack.c.h.s8.bf16 %v447_v14 }
  0x86   :  { %563 = vmatpush1.bf16.msra.mxu0 %v472_v4  ;;  %1148 = vmatpush3.bf16.msra.mxu1 %v474_v37  ;;  %v437_v37 = vld [vmem:[#allocation7 + $0xf8] sm:$0xff] }
  0x87   :  { %564 = vmatprep.subr.bf16.mxu0 %v476_v7  ;;  %1149 = vmatprep.subr.bf16.mxu1 %v501_v39  ;;  %v502_v7 = vunpack.c.l.s8.bf16 %v430_v0  ;;  %v515_v43 = vunpack.c.l.s8.bf16 %v437_v37 }
  0x8a   :  { %565 = vmatpush1.bf16.msra.mxu0 %v475_v10  ;;  %1150 = vmatpush3.bf16.msra.mxu1 %v477_v41  ;;  %v506_v10 = vunpack.c.h.s8.bf16 %v431_v42  ;;  %v513_v42 = vunpack.c.h.s8.bf16 %v435_v23 }
  0x8b   :  { %566 = vmatprep.subr.bf16.mxu0 %v479_v12  ;;  %1157 = vmatprep.subr.bf16.mxu1 %v528_v45  ;;  %v137_v12 = vrot.slane %v120_v49, %v136_v2  ;;  %v436_v45 = vld [vmem:[#allocation7 + $0xf0] sm:$0xff]  ;;  %v516_v49 = vunpack.c.l.s8.bf16 %v438_v46  ;;  %v443_v2 = vld [vmem:[#allocation7 + $0x128] sm:$0xff] }
  0x8c   :  { %v514_v47 = vunpack.c.l.s8.bf16 %v436_v45 }
  0x8e   :  { %567 = vmatpush1.bf16.msra.mxu0 %v478_v15 }
  0x8f   :  { %568 = vmatprep.subr.bf16.mxu0 %v482_v16  ;;  %v505_v16 = vunpack.c.h.s8.bf16 %v430_v0 }
  0x92   :  { %569 = vmatpush1.bf16.msra.mxu0 %v481_v18 }
  0x93   :  { %570 = vmatprep.subr.bf16.mxu0 %v485_v19 }
  0x96   :  { %571 = vmatpush1.bf16.msra.mxu0 %v484_v21  ;;  %v534_v21 = vunpack.c.l.s8.bf16 %v447_v14 }
  0x97   :  { %572 = vmatprep.subr.bf16.mxu0 %v488_v22  ;;  %v433_v22 = vld [vmem:[#allocation7 + $0xd8] sm:$0xff] }
  0x98   :  { %v508_v31 = vunpack.c.l.s8.bf16 %v433_v22  ;;  %v511_v41 = vunpack.c.h.s8.bf16 %v433_v22 }
  0x9a   :  { %573 = vmatpush1.bf16.msra.mxu0 %v487_v24 }
  0x9b   :  { %574 = vmatprep.subr.bf16.mxu0 %v491_v25 }
  0x9e   :  { %575 = vmatpush1.bf16.msra.mxu0 %v490_v27 }
  0x9f   :  { %576 = vmatprep.subr.bf16.mxu0 %v494_v28 }
  0xa2   :  { %577 = vmatpush1.bf16.msra.mxu0 %v493_v29 }
  0xa3   :  { %578 = vmatprep.subr.bf16.mxu0 %v497_v32  ;;  %v510_v32 = vunpack.c.l.s8.bf16 %v435_v23 }
  0xa6   :  { %579 = vmatpush1.bf16.msra.mxu0 %v496_v36 }
  0xa7   :  { %580 = vmatprep.subr.bf16.mxu0 %v500_v38  ;;  %v450_v38 = vld [vmem:[#allocation7 + $0x160] sm:$0xff] }
  0xaa   :  { %581 = vmatpush1.bf16.msra.mxu0 %v499_v40 }
  0xab   :  { %593 = vmatprep.subr.bf16.mxu0 %v503_v44  ;;  %v540_v44 = vunpack.c.l.s8.bf16 %v450_v38 }
 0x140   :  { %v342_v53 = vpop.f32.mrb[0].mxu0  ;;  %v385_v15 = vpop.f32.mrb[0].mxu1 }
 0x141   :  { %v343_v54 = vadd.f32 %v342_v53, %v125_v51  ;;  %v344_v55 = vpop.f32.mrb[1].mxu0  ;;  %v386_v18 = vadd.f32 %v385_v15, %v133_v9  ;;  %v387_v19 = vpop.f32.mrb[1].mxu1  ;;  %v440_v53 = vld [vmem:[#allocation7 + $0x110] sm:$0xff]  ;;  %v449_v15 = vld [vmem:[#allocation7 + $0x158] sm:$0xff] }
 0x142   :  { %v345_v56 = vadd.f32 %v344_v55, %v129_v52  ;;  %v346_v57 = vpop.f32.mrb[2].mxu0  ;;  %v388_v24 = vadd.f32 %v387_v19, %v137_v12  ;;  %v389_v25 = vpop.f32.mrb[2].mxu1  ;;  %v517_v55 = vunpack.c.h.s8.bf16 %v436_v45  ;;  %v524_v0 = vunpack.c.h.s8.bf16 %v440_v53 }
 0x143   :  { %v347_v58 = vadd.f32 %v346_v57, %v125_v51  ;;  %v348_v59 = vpop.f32.mrb[3].mxu0  ;;  %v394_v62 = vmax.f32 %v343_v54, 0.0  ;;  %v396_v26 = vmax.f32 %v386_v18, 0.0  ;;  %v390_v27 = vadd.f32 %v389_v25, %v133_v9  ;;  %v391_v28 = vpop.f32.mrb[3].mxu1  ;;  %v453_v54 = vld [vmem:[#allocation7 + $0x178] sm:$0xff]  ;;  %v446_v9 = vld [vmem:[#allocation7 + $0x140] sm:$0xff] }
 0x144   :  { %v349_v60 = vadd.f32 %v348_v59, %v129_v52  ;;  %v395_v3 = vmax.f32 %v345_v56, 0.0  ;;  %v397_v29 = vmax.f32 %v388_v24, 0.0  ;;  %v392_v30 = vadd.f32 %v391_v28, %v137_v12  ;;  %v439_v59 = vld [vmem:[#allocation7 + $0x108] sm:$0xff]  ;;  %v445_v12 = vld [vmem:[#allocation7 + $0x138] sm:$0xff]  ;;  %v448_v18 = vld [vmem:[#allocation7 + $0x150] sm:$0xff] }
 0x145   :  { %v398_v63 = vmax.f32 %v347_v58, 0.0  ;;  %v400_v33 = vmax.f32 %v390_v27, 0.0  ;;  %v518_v51 = vunpack.c.h.s8.bf16 %v437_v37  ;;  %v543_v52 = vunpack.c.h.s8.bf16 %v450_v38  ;;  %v451_v24 = vld [vmem:[#allocation7 + $0x168] sm:$0xff]  ;;  %v1299_v28 = vld [vmem:[#allocation8 + $0x40] sm:$0xff]  }
 0x146   :  { %v399_v4 = vmax.f32 %v349_v60, 0.0  ;;  %v401_v36 = vmax.f32 %v392_v30, 0.0  ;;  %v519_v56 = vunpack.c.h.s8.bf16 %v438_v46  ;;  %v521_v57 = vunpack.c.l.s8.bf16 %v440_v53  ;;  %v441_v60 = vld [vmem:[#allocation7 + $0x118] sm:$0xff]  ;;  %v1301_v30 = vld [vmem:[#allocation8 + $0x48] sm:$0xff]   ;;  %v1308_v37 = vld [vmem:[#allocation8 + $0x20] sm:$0xff]  }
 0x147   :  { %v402_v5 = vpack.c.bf16 %v398_v63, %v394_v62  ;;  %v1572_v39 = vpack.c.bf16 %v400_v33, %v396_v26  ;;  %v546_v58 = vunpack.c.l.s8.bf16 %v453_v54  ;;  %v520_v62 = vunpack.c.l.s8.bf16 %v439_v59  ;;  %v1304_v33 = vld [vmem:[#allocation8 + $0x10] sm:$0xff]   ;;  %v1309_v38 = vld [vmem:[#allocation8 + $0x68] sm:$0xff]   ;;  %v718_v53 = vld [vmem:[%s1616_s4] sm:$0x7] }
 0x148   :  { %v403_v6 = vpack.c.bf16 %v399_v4, %v395_v3  ;;  %v405_v40 = vpack.c.bf16 %v401_v36, %v397_v29  ;;  %v522_v63 = vunpack.c.l.s8.bf16 %v441_v60  ;;  %v549_v1 = vunpack.c.h.s8.bf16 %v453_v54  ;;  %v1300_v29 = vld [vmem:[#allocation8] sm:$0xff]  }
 0x149   :  { %v523_v3 = vunpack.c.h.s8.bf16 %v439_v59  ;;  %v525_v4 = vunpack.c.h.s8.bf16 %v441_v60  ;;  %v532_v13 = vunpack.c.l.s8.bf16 %v445_v12  ;;  %v536_v14 = vunpack.c.h.s8.bf16 %v446_v9  ;;  %v1307_v36 = vld [vmem:[#allocation8 + $0x60] sm:$0xff]  }
 0x14a   :  { %582 = vmatprep.mubr.bf16.mxu0 %v403_v6  ;;  %668 = vmatprep.mubr.bf16.mxu1 %v403_v6  ;;  %v442_v6 = vld [vmem:[#allocation7 + $0x120] sm:$0xff]  ;;  %v538_v19 = vunpack.c.l.s8.bf16 %v448_v18  ;;  %v541_v22 = vunpack.c.h.s8.bf16 %v448_v18  ;;  %v544_v25 = vunpack.c.l.s8.bf16 %v451_v24  ;;  %v547_v27 = vunpack.c.h.s8.bf16 %v451_v24 }
 0x14b   :  { %583 = vmatmul.mubr.bf16.vlgmr.msra.gmra.mrb[4].mxu0 %v402_v5  ;;  %669 = vmatmul.mubr.bf16.vlgmr.msra.gmra.mrb[4].mxu1 %v402_v5  ;;  %v527_v5 = vunpack.c.l.s8.bf16 %v443_v2 }
 0x14c   :  { %594 = vmatpush1.bf16.msra.mxu0 %v502_v7  ;;  %1158 = vmatpush3.bf16.msra.mxu1 %v504_v8  ;;  %v526_v7 = vunpack.c.l.s8.bf16 %v442_v6  ;;  %v530_v8 = vunpack.c.h.s8.bf16 %v443_v2 }
 0x14d   :  { %595 = vmatprep.subr.bf16.mxu0 %v506_v10  ;;  %1159 = vmatprep.subr.bf16.mxu1 %v531_v11  ;;  %v529_v10 = vunpack.c.h.s8.bf16 %v442_v6  ;;  %v533_v11 = vunpack.c.l.s8.bf16 %v446_v9  ;;  %v723_v9 = vrot.slane %v718_v53, %v1560_v48 }
 0x14e   :  { %709 = vmatprep.mubr.bf16.mxu1 %v405_v40  ;;  %625 = vmatprep.mubr.bf16.mxu0 %v405_v40  ;;  %v1311_v40 = vld [vmem:[#allocation8 + $0x70] sm:$0xff]  }
 0x150   :  { %596 = vmatpush1.bf16.msra.mxu0 %v505_v16  ;;  %1160 = vmatpush3.bf16.msra.mxu1 %v507_v17  ;;  %v535_v16 = vunpack.c.h.s8.bf16 %v445_v12  ;;  %v539_v17 = vunpack.c.l.s8.bf16 %v449_v15 }
 0x151   :  { %597 = vmatprep.subr.bf16.mxu0 %v509_v20  ;;  %1161 = vmatprep.subr.bf16.mxu1 %v534_v21  ;;  %v542_v20 = vunpack.c.h.s8.bf16 %v449_v15  ;;  %v452_v21 = vld [vmem:[#allocation7 + $0x170] sm:$0xff] }
 0x152   :  { %v545_v23 = vunpack.c.l.s8.bf16 %v452_v21  ;;  %v548_v26 = vunpack.c.h.s8.bf16 %v452_v21 }
 0x154   :  { %598 = vmatpush1.bf16.msra.mxu0 %v508_v31  ;;  %1162 = vmatpush3.bf16.msra.mxu1 %v510_v32  ;;  %v1302_v31 = vld [vmem:[#allocation8 + $0x8] sm:$0xff]   ;;  %v1303_v32 = vld [vmem:[#allocation8 + $0x50] sm:$0xff]  }
 0x155   :  { %599 = vmatprep.subr.bf16.mxu0 %v512_v34  ;;  %1163 = vmatprep.subr.bf16.mxu1 %v537_v35  ;;  %v1305_v34 = vld [vmem:[#allocation8 + $0x58] sm:$0xff]  }
 0x156   :  { %v1306_v35 = vld [vmem:[#allocation8 + $0x18] sm:$0xff]  }
 0x158   :  { %600 = vmatpush1.bf16.msra.mxu0 %v511_v41  ;;  %1164 = vmatpush3.bf16.msra.mxu1 %v513_v42  ;;  %v1312_v41 = vld [vmem:[#allocation8 + $0x30] sm:$0xff]   ;;  %v1313_v42 = vld [vmem:[#allocation8 + $0x78] sm:$0xff]  }
 0x159   :  { %601 = vmatprep.subr.bf16.mxu0 %v515_v43  ;;  %1165 = vmatprep.subr.bf16.mxu1 %v540_v44  ;;  %v1314_v43 = vld [vmem:[#allocation8 + $0x38] sm:$0xff]   ;;  %v1456_v44 = vmov 0.0  }
 0x15c   :  { %602 = vmatpush1.bf16.msra.mxu0 %v514_v47  ;;  %1166 = vmatpush3.bf16.msra.mxu1 %v516_v49 }
 0x15d   :  { %603 = vmatprep.subr.bf16.mxu0 %v518_v51  ;;  %1167 = vmatprep.subr.bf16.mxu1 %v543_v52 }
 0x160   :  { %604 = vmatpush1.bf16.msra.mxu0 %v517_v55  ;;  %1168 = vmatpush3.bf16.msra.mxu1 %v519_v56  ;;  %v741_v56 = vld [vmem:[%s1617_s5] sm:$0x7] }
 0x161   :  { %605 = vmatprep.subr.bf16.mxu0 %v521_v57  ;;  %1169 = vmatprep.subr.bf16.mxu1 %v546_v58  ;;  %v731_v58 = vrot.slane %v718_v53, %v1569_v61 }
 0x164   :  { %606 = vmatpush1.bf16.msra.mxu0 %v520_v62  ;;  %1170 = vmatpush3.bf16.msra.mxu1 %v522_v63  ;;  %v754_v63 = vrot.slane %v741_v56, %v1569_v61 }
 0x165   :  { %607 = vmatprep.subr.bf16.mxu0 %v524_v0  ;;  %1171 = vmatprep.subr.bf16.mxu1 %v549_v1 }
 0x168   :  { %608 = vmatpush1.bf16.msra.mxu0 %v523_v3  ;;  %1172 = vmatpush3.bf16.msra.mxu1 %v525_v4 }
 0x169   :  { %609 = vmatprep.subr.bf16.mxu0 %v527_v5  ;;  %1179 = vmatprep.subr.bf16.mxu1 %v1299_v28 }
 0x16b   :  { %710 = vmatmul.mubr.bf16.vlgmr.msra.gmra.mrb[8].mxu1 %v1572_v39 }
 0x16c   :  { %610 = vmatpush1.bf16.msra.mxu0 %v526_v7  ;;  %1180 = vmatpush3.bf16.msra.mxu1 %v1300_v29  ;;  %v1315_v29 = vld [vmem:[#allocation8 + $0x80] sm:$0xff]  }
 0x16d   :  { %611 = vmatprep.subr.bf16.mxu0 %v530_v8  ;;  %1181 = vmatprep.subr.bf16.mxu1 %v1301_v30  ;;  %v1317_v30 = vld [vmem:[#allocation8 + $0x90] sm:$0xff]  }
 0x170   :  { %612 = vmatpush1.bf16.msra.mxu0 %v529_v10  ;;  %1182 = vmatpush3.bf16.msra.mxu1 %v1302_v31  ;;  %v727_v10 = vrot.slane %v718_v53, %v1565_v50  ;;  %v1318_v31 = vld [vmem:[#allocation8 + $0x98] sm:$0xff]  }
 0x171   :  { %613 = vmatprep.subr.bf16.mxu0 %v533_v11  ;;  %1183 = vmatprep.subr.bf16.mxu1 %v1303_v32  ;;  %v746_v11 = vrot.slane %v741_v56, %v1560_v48  ;;  %v1319_v32 = vld [vmem:[#allocation8 + $0xa0] sm:$0xff]  }
 0x174   :  { %614 = vmatpush1.bf16.msra.mxu0 %v532_v13  ;;  %1184 = vmatpush3.bf16.msra.mxu1 %v1304_v33  ;;  %v750_v13 = vrot.slane %v741_v56, %v1565_v50  ;;  %v1316_v50 = vld [vmem:[#allocation8 + $0x88] sm:$0xff]  }
 0x175   :  { %615 = vmatprep.subr.bf16.mxu0 %v536_v14  ;;  %1185 = vmatprep.subr.bf16.mxu1 %v1305_v34  ;;  %v1320_v33 = vld [vmem:[#allocation8 + $0xa8] sm:$0xff]   ;;  %v1321_v34 = vld [vmem:[#allocation8 + $0xb0] sm:$0xff]  }
 0x178   :  { %616 = vmatpush1.bf16.msra.mxu0 %v535_v16  ;;  %1186 = vmatpush3.bf16.msra.mxu1 %v1306_v35  ;;  %v1322_v35 = vld [vmem:[#allocation8 + $0xb8] sm:$0xff]  }
 0x179   :  { %617 = vmatprep.subr.bf16.mxu0 %v539_v17  ;;  %1187 = vmatprep.subr.bf16.mxu1 %v1307_v36 }
 0x17c   :  { %618 = vmatpush1.bf16.msra.mxu0 %v538_v19  ;;  %1188 = vmatpush3.bf16.msra.mxu1 %v1308_v37 }
 0x17d   :  { %619 = vmatprep.subr.bf16.mxu0 %v542_v20  ;;  %1189 = vmatprep.subr.bf16.mxu1 %v1309_v38 }
 0x180   :  { %620 = vmatpush1.bf16.msra.mxu0 %v541_v22 }
 0x181   :  { %621 = vmatprep.subr.bf16.mxu0 %v545_v23 }
 0x184   :  { %622 = vmatpush1.bf16.msra.mxu0 %v544_v25 }
 0x185   :  { %623 = vmatprep.subr.bf16.mxu0 %v548_v26 }
 0x188   :  { %624 = vmatpush1.bf16.msra.mxu0 %v547_v27 }
 0x18b   :  { %626 = vmatmul.mubr.bf16.vlgmr.msra.gmra.mrb[4].mxu0 %v1572_v39  ;;  %v1310_v39 = vld [vmem:[#allocation8 + $0x28] sm:$0xff]  }
 0x18c   :  { %1190 = vmatpush3.bf16.msra.mxu1 %v1310_v39 }
 0x18d   :  { %1191 = vmatprep.subr.bf16.mxu1 %v1311_v40 }
 0x190   :  { %1192 = vmatpush3.bf16.msra.mxu1 %v1312_v41 }
 0x191   :  { %1193 = vmatprep.subr.bf16.mxu1 %v1313_v42  ;;  %v1110_v42 = vld [vmem:[%s1619_s7] ss:$0 sm:$0xff] }
 0x194   :  { %1194 = vmatpush3.bf16.msra.mxu1 %v1314_v43 }
 0x195   :  { %1210 = vmatprep.subr.bf16.mxu1 %v1456_v44 }
 0x21e   :  { %v1151_v45 = vpop.f32.mrb[4].mxu1 }
 0x21f   :  { %v1152_v46 = vpop.f32.mrb[5].mxu1 }
 0x220   :  { %v1153_v47 = vadd.f32 %v1152_v46, %v1151_v45  ;;  %v1154_v49 = vpop.f32.mrb[6].mxu1 }
 0x221   :  { %v1155_v51 = vpop.f32.mrb[7].mxu1 }
 0x222   :  { %v1156_v52 = vadd.f32 %v1155_v51, %v1154_v49 }
 0x23e   :  { %v1173_v54 = vpop.f32.mrb[8].mxu1 }
 0x23f   :  { %v1174_v55 = vpop.f32.mrb[9].mxu1 }
 0x240   :  { %v1175_v57 = vadd.f32 %v1174_v55, %v1173_v54  ;;  %v1176_v59 = vpop.f32.mrb[10].mxu1 }
 0x241   :  { %v1177_v60 = vpop.f32.mrb[11].mxu1 }
 0x242   :  { %v712_v62 = vadd.f32 %v1175_v57, %v1153_v47  ;;  %v1178_v0 = vadd.f32 %v1177_v60, %v1176_v59 }
 0x244   :  { %v737_v1 = vmul.f32 %v731_v58, %v712_v62  ;;  %v715_v2 = vadd.f32 %v1178_v0, %v1156_v52 }
 0x246   :  { %v760_v3 = vadd.f32 %v754_v63, %v737_v1  ;;  %v740_v4 = vmul.f32 %v731_v58, %v715_v2 }
 0x248   :  { %v763_v5 = vadd.f32 %v754_v63, %v740_v4  ;;  %v766_v6 = vmax.f32 %v760_v3, 0.0 }
 0x24a   :  { %v769_v7 = vmax.f32 %v763_v5, 0.0 }
 0x24c   :  { %v772_v8 = vpack.c.bf16 %v769_v7, %v766_v6 }
 0x25e   :  { %v627_v12 = vpop.f32.mrb[4].mxu0 }
 0x25f   :  { %v735_v14 = vmul.f32 %v723_v9, %v627_v12  ;;  %v629_v61 = vpop.f32.mrb[5].mxu0 }
 0x260   :  { %v736_v15 = vmul.f32 %v727_v10, %v629_v61  ;;  %v631_v16 = vpop.f32.mrb[6].mxu0 }
 0x261   :  { %v758_v17 = vadd.f32 %v746_v11, %v735_v14  ;;  %v738_v18 = vmul.f32 %v723_v9, %v631_v16  ;;  %v633_v19 = vpop.f32.mrb[7].mxu0 }
 0x262   :  { %v759_v20 = vadd.f32 %v750_v13, %v736_v15  ;;  %v739_v21 = vmul.f32 %v727_v10, %v633_v19 }
 0x263   :  { %v761_v22 = vadd.f32 %v746_v11, %v738_v18  ;;  %v764_v24 = vmax.f32 %v758_v17, 0.0 }
 0x264   :  { %v762_v23 = vadd.f32 %v750_v13, %v739_v21  ;;  %v765_v26 = vmax.f32 %v759_v20, 0.0 }
 0x265   :  { %v767_v25 = vmax.f32 %v761_v22, 0.0 }
 0x266   :  { %v768_v27 = vmax.f32 %v762_v23, 0.0 }
 0x267   :  { %v770_v28 = vpack.c.bf16 %v767_v25, %v764_v24 }
 0x268   :  { %v771_v48 = vpack.c.bf16 %v768_v27, %v765_v26 }
 0x26a   :  { %1004 = vmatprep.mubr.bf16.mxu1 %v771_v48 }
 0x26b   :  { %1005 = vmatmul.mubr.bf16.vlgmr.msra.gmra.mrb[12].mxu1 %v770_v28 }
 0x26c   :  { %1211 = vmatpush3.bf16.msra.mxu1 %v1315_v29  ;;  %1226 = vmatprep.mubr.msk.bf16.mxu1 %vm1457_vm0, %v1456_v44 }
 0x26d   :  { %1212 = vmatprep.subr.bf16.mxu1 %v1456_v44 }
 0x270   :  { %1213 = vmatpush3.bf16.msra.mxu1 %v1316_v50 }
 0x271   :  { %1214 = vmatprep.subr.bf16.mxu1 %v1456_v44 }
 0x274   :  { %1215 = vmatpush3.bf16.msra.mxu1 %v1317_v30 }
 0x275   :  { %1216 = vmatprep.subr.bf16.mxu1 %v1456_v44 }
 0x278   :  { %1217 = vmatpush3.bf16.msra.mxu1 %v1318_v31 }
 0x279   :  { %1218 = vmatprep.subr.bf16.mxu1 %v1456_v44 }
 0x27c   :  { %1219 = vmatpush3.bf16.msra.mxu1 %v1319_v32 }
 0x27d   :  { %1220 = vmatprep.subr.bf16.mxu1 %v1456_v44 }
 0x280   :  { %1221 = vmatpush3.bf16.msra.mxu1 %v1320_v33 }
 0x281   :  { %1222 = vmatprep.subr.bf16.mxu1 %v1456_v44 }
 0x284   :  { %1223 = vmatpush3.bf16.msra.mxu1 %v1321_v34 }
 0x285   :  { %1224 = vmatprep.subr.bf16.mxu1 %v1456_v44 }
 0x288   :  { %1225 = vmatpush3.bf16.msra.mxu1 %v1322_v35 }
 0x28b   :  { %1227 = vmatmul.mubr.bf16.vlgmr.msra.gmra.mrb[16].mxu1 %v772_v8 }
 0x33e   :  { %v1195_v36 = vpop.f32.mrb[12].mxu1 }
 0x33f   :  { %v1196_v37 = vpop.f32.mrb[13].mxu1 }
 0x340   :  { %v1197_v38 = vadd.f32 %v1196_v37, %v1195_v36  ;;  %v1198_v39 = vpop.f32.mrb[14].mxu1 }
 0x341   :  { %v1199_v40 = vpop.f32.mrb[15].mxu1 }
 0x342   :  { %v1200_v41 = vadd.f32 %v1199_v40, %v1198_v39  ;;  %v1007_v43 = vadd.f32 %v1197_v38, %v1110_v42 }
 0x344   :  { %v1010_v49 = vadd.f32 %v1200_v41, %v1110_v42 }
 0x35e   :  { %v1047_v45 = vpop.f32.mrb[16].mxu1 }
 0x35f   :  { %v1048_v46 = vadd.f32 %v1047_v45, %v1007_v43  ;;  %v1228_v47 = vpop.f32.mrb[17].mxu1 }
 0x360   :  { %v1050_v51 = vpop.f32.mrb[18].mxu1 }
 0x361   :  { %1323 = vtanh.f32 %v1048_v46  ;;  %v1051_v44 = vadd.f32 %v1050_v51, %v1010_v49  ;;  %v1229_v52 = vpop.f32.mrb[19].mxu1 }
 0x363   :  { %1325 = vtanh.f32 %v1051_v44 }
 0x36b   :  { %v1324_v53 = vpop.eup %1323 }
 0x36c   :  { %1056 = vst [vmem:[#allocation10] sm:$0xff] %v1324_v53 }
 0x36d   :  { %v1326_v54 = vpop.eup %1325 }
 0x36e   :  { %1057 = vst [vmem:[#allocation10 + $0x8] sm:$0xff] %v1326_v54 }
 0x36f   :  { %1426 = shalt.err (!%p1423_p8)
}
 0x370   :  { %s1427_s19 = scalar_lea.hbm %s1620_s8, 256 }
 0x371   :  { %p1428_p9 = scmp.ne.s32.totalorder %s1620_s8, %s1427_s19  ;;  %p1431_p10 = scmp.lt.u32.totalorder %s1427_s19, %s1620_s8 }
 0x373   :  { %p1433_p11 = pnand %p1431_p10, %p1428_p9 }
 0x375   :  { %1436 = shalt.err (!%p1433_p11)
}
 0x376   :  { %s1459_s23 = smov 128   ;;  %s1460_s24 = smov 8  }
 0x377   :  { %1069 = dma.vmem_to_hbm [thread:$0]  %s1064_s16, 256, %s1620_s8, [#allocation4], %s1459_s23, %s1459_s23, %s1460_s24  }
 0x378   :  { %1443 = dma.done.wait [#allocation4], 256  }
 0x379   :  { %1444 = vsyncadd [#allocation4], 4294967040 }
 0x37a   :  { %1073 = vsyncpa [#allocation3], 1 }
 0x37b   :  { %1074 = vsyncpa [#allocation6], 1 }
 0x37c   :  { %1075 = vsyncpa [#allocation9], 1 }
 0x37d   :  { %1076 = vsyncpa [#allocation4], 1 }

</bundles_post_ra>
